<compile_context>
chip_gen: v7x
topology: tpu7x:2x2x1
jax: 0.10.0
libtpu: 0.0.40
codegen_flags: <defaults>
</compile_context>

<pallas_src>
import functools
import math

import jax
import jax.numpy as jnp
from jax.experimental import pallas as pl
from jax.experimental.pallas import tpu as pltpu


# ----------------------------------------------------------------------------- kernel
def _se_kernel(x_ref, w1_ref, b1_ref, w2_ref, b2_ref, o_ref, acc_ref, *,
               total_l: int, tile_l: int):
    """Process one (TB, Cg, TL) tile of x; finalize the SE gate at the last L tile."""
    l = pl.program_id(1)
    last = pl.num_programs(1) - 1

    @pl.when(l == 0)
    def _init():
        acc_ref[...] = jnp.zeros_like(acc_ref)

    def _accumulate(mask_tail):
        x = x_ref[...].astype(jnp.float32)                       # (TB, Cg, TL)
        if mask_tail:
            pos = l * tile_l + jax.lax.broadcasted_iota(jnp.int32, x.shape, 2)
            x = jnp.where(pos < total_l, x, 0.0)
        acc_ref[...] += jnp.sum(x, axis=-1)                      # (TB, Cg) partials

    if total_l % tile_l != 0:
        # Only the final L tile is ragged: keep the mask out of the hot loop.
        @pl.when(l < last)
        def _plain():
            _accumulate(False)

        @pl.when(l == last)
        def _masked():
            _accumulate(True)
    else:
        _accumulate(False)

    @pl.when(l == last)
    def _finalize():
        pooled = acc_ref[...] * (1.0 / total_l)                  # mean over FULL L
        h = jnp.dot(pooled, w1_ref[...],
                    preferred_element_type=jnp.float32) + b1_ref[...]
        h = jnp.maximum(h, 0.0)                                  # ReLU
        s = jnp.dot(h, w2_ref[...],
                    preferred_element_type=jnp.float32) + b2_ref[...]
        # Sigmoid: exp + approximate reciprocal, both on the EUP slot.
        o_ref[...] = (pl.reciprocal(1.0 + jnp.exp(-s), approx=True)
                      ).astype(o_ref.dtype)


# ----------------------------------------------------------------------------- helpers
def _round_up(v, m):
    return ((v + m - 1) // m) * m


def _sublanes(itemsize):
    # Sublanes per vreg for a dtype: 8 (f32), 16 (bf16), 32 (int8/fp8).
    return max(8, 32 // int(itemsize))


def _fold_factor(B, C, sub):
    """Batches folded into the channel axis so g*C fills (a multiple of) sublanes."""
    if C % sub == 0:
        return 1
    g = sub // math.gcd(C, sub)          # power of two
    while g > 1 and B % g != 0:
        g //= 2
    return g


def _block_diag(w, g):
    if g == 1:
        return w
    r, c = w.shape
    out = jnp.zeros((g * r, g * c), w.dtype)
    for k in range(g):
        out = jax.lax.dynamic_update_slice(out, w, (k * r, k * c))
    return out


def _vmem_capacity_bytes():
    try:
        info = pltpu.get_tpu_info()
        cap = getattr(info, "vmem_capacity_bytes", None)
        if cap:
            return int(cap)
    except Exception:
        pass
    return 64 * 2 ** 20                  # conservative: assume a 64-MiB part (v7x)


def _pick_tiles(Bg, Cg, L, itemsize, sub, tb, tl, x_target):
    # Batch tile: try to produce >= 2 blocks (v7x megacore) while keeping the
    # output block's sublane dim a multiple of 8 (or the full batch extent).
    if tb is None:
        if Bg > 8:
            tb = min(128, _round_up(pl.cdiv(Bg, 2), 8))
            if tb >= Bg:
                tb = Bg
        else:
            tb = Bg
    else:
        tb = min(tb, Bg)
    if tb < Bg and tb % 8 != 0:
        tb = max(8, (tb // 8) * 8)
        if tb >= Bg:
            tb = Bg

    # L tile: multiple of 128 (or full L), sized so one pipeline buffer of x —
    # INCLUDING sublane/lane layout padding — is roughly x_target bytes.
    if tl is None:
        bytes_per_128 = tb * _round_up(Cg, sub) * 128 * itemsize
        tl = max(128, (x_target // max(1, bytes_per_128)) * 128)
    if tl >= L:
        tl = L
    else:
        tl = max(128, (tl // 128) * 128)
        if tl >= L:
            tl = L
    return tb, tl


# ----------------------------------------------------------------------------- wrapper
def se_block_1d(x, w1, b1, w2, b2, *, tb=None, tl=None):
    """Squeeze-and-Excitation forward: x (B, C, L) -> gate (B, C, 1)."""
    B, C, L = x.shape
    H = w1.shape[1]
    assert w1.shape == (C, H) and w2.shape == (H, C)
    assert b1.shape == (1, H) and b2.shape == (1, C)

    itemsize = int(x.dtype.itemsize)
    sub = _sublanes(itemsize)

    # Small-C sublane packing: fold g batches into the channel axis (free in HBM)
    # and use block-diagonal weights so the kernel math is unchanged per batch.
    g = _fold_factor(B, C, sub)
    Bg, Cg, Hg = B // g, C * g, H * g
    xg = x.reshape(Bg, Cg, L)
    w1g, w2g = _block_diag(w1, g), _block_diag(w2, g)
    b1g, b2g = jnp.tile(b1, (1, g)), jnp.tile(b2, (1, g))

    # Generation-aware VMEM budget / per-buffer x-tile target.
    phys = _vmem_capacity_bytes()
    if phys >= 100 * 2 ** 20:            # v5e / v6e: 128 MiB VMEM per TensorCore
        budget, x_target = 96 * 2 ** 20, 28 * 2 ** 20
    else:                                # v7x: 64 MiB per TensorCore
        budget, x_target = 48 * 2 ** 20, 16 * 2 ** 20

    tb, tl = _pick_tiles(Bg, Cg, L, itemsize, sub, tb, tl, x_target)

    def _estimate(tl_):
        x_buf = tb * _round_up(Cg, sub) * _round_up(tl_, 128) * itemsize
        w_bytes = 0
        for a in (w1g, b1g, w2g, b2g):
            s = _sublanes(int(a.dtype.itemsize))
            w_bytes += (_round_up(a.shape[0], s) * _round_up(a.shape[1], 128)
                        * int(a.dtype.itemsize))
        io_buf = _round_up(tb, 8) * _round_up(Cg, 128) * 4       # out block / acc (f32)
        return 2 * x_buf + 2 * w_bytes + 2 * io_buf + io_buf

    est = _estimate(tl)
    while est > budget and tl > 128:     # padded estimate must fit the budget
        tl = max(128, ((tl // 2) // 128) * 128)
        est = _estimate(tl)
    vmem_limit = int(min(budget, max(est + est // 4, 24 * 2 ** 20)))

    nb, nl = pl.cdiv(Bg, tb), pl.cdiv(L, tl)
    kernel = functools.partial(_se_kernel, total_l=L, tile_l=tl)

    cost = pl.CostEstimate(
        flops=4 * B * C * H + B * C * L,                         # 2 GEMMs + pooling adds
        transcendentals=2 * B * C,                               # exp + reciprocal
        bytes_accessed=(x.nbytes + w1.nbytes + b1.nbytes + w2.nbytes + b2.nbytes
                        + B * C * 4))

    out = pl.pallas_call(
        kernel,
        out_shape=jax.ShapeDtypeStruct((Bg, Cg), jnp.float32),
        grid_spec=pltpu.PrefetchScalarGridSpec(
            num_scalar_prefetch=0,
            grid=(nb, nl),
            in_specs=[
                # (TB, Cg, TL) tile of x; Cg is full, TL is a multiple of 128 (or full L).
                pl.BlockSpec((tb, Cg, tl), lambda b, l: (b, 0, l)),
                # Weights/biases: constant index maps -> fetched once, stay resident.
                pl.BlockSpec((Cg, Hg), lambda b, l: (0, 0)),
                pl.BlockSpec((1, Hg), lambda b, l: (0, 0)),
                pl.BlockSpec((Hg, Cg), lambda b, l: (0, 0)),
                pl.BlockSpec((1, Cg), lambda b, l: (0, 0)),
            ],
            out_specs=pl.BlockSpec((tb, Cg), lambda b, l: (b, 0)),
            scratch_shapes=[pltpu.VMEM((tb, Cg), jnp.float32)],   # f32 sum accumulator
        ),
        compiler_params=pltpu.CompilerParams(
            dimension_semantics=("parallel", "arbitrary"),        # batch parallel, L reduce
            vmem_limit_bytes=vmem_limit,
        ),
        cost_estimate=cost,
    )(xg, w1g, b1g, w2g, b2g)

    # Unfold the batch packing and apply the final .view(B, C, 1) — free reshapes.
    return out.reshape(B, C, 1).astype(x.dtype)


# ----------------------------------------------------------------------------- reference & tests
def _reference(x, w1, b1, w2, b2):
    pooled = jnp.mean(x.astype(jnp.float32), axis=-1)            # (B, C)
    h = jnp.maximum(pooled @ w1 + b1, 0.0)
    s = jax.nn.sigmoid(h @ w2 + b2)
    return s[..., None].astype(x.dtype)


def _make_params(key, C, H, dtype=jnp.float32):
    k1, k2, k3, k4 = jax.random.split(key, 4)
    w1 = jax.random.normal(k1, (C, H), dtype=dtype) * 0.1        # (in, out)
    b1 = jax.random.normal(k2, (1, H), dtype=dtype) * 0.1
    w2 = jax.random.normal(k3, (H, C), dtype=dtype) * 0.1
    b2 = jax.random.normal(k4, (1, C), dtype=dtype) * 0.1
    return w1, b1, w2, b2


if __name__ == "__main__":
    key = jax.random.PRNGKey(0)

    # Sigmoid uses the approximate EUP reciprocal -> slightly loosened tolerance.
    ATOL_F32, ATOL_BF16, RTOL = 5e-3, 2e-2, 1e-5

    # ---- Test 1: nominal module shape (B=2, C=4, L=16, r=4): small-C fold path ----
    kx, kp, key = jax.random.split(key, 3)
    B, C, L, r = 2, 4, 16, 4
    H = C * r
    x = jax.random.normal(kx, (B, C, L), dtype=jnp.float32)
    w1, b1, w2, b2 = _make_params(kp, C, H)
    y = jax.block_until_ready(se_block_1d(x, w1, b1, w2, b2))
    y_ref = _reference(x, w1, b1, w2, b2)
    assert y.shape == (B, C, 1), y.shape
    assert jnp.allclose(y, y_ref, atol=ATOL_F32, rtol=RTOL), "mismatch vs reference (test 1)"

    # ---- Test 2: batched TB + L reduction with ragged last tile (C fills sublanes) ----
    kx2, kp2, key = jax.random.split(key, 3)
    B2, C2, L2, r2 = 16, 8, 320, 4
    H2 = C2 * r2
    x2 = jax.random.normal(kx2, (B2, C2, L2), dtype=jnp.float32)
    w1b, b1b, w2b, b2b = _make_params(kp2, C2, H2)
    y2 = jax.block_until_ready(se_block_1d(x2, w1b, b1b, w2b, b2b, tl=128))
    y2_ref = _reference(x2, w1b, b1b, w2b, b2b)
    assert y2.shape == (B2, C2, 1), y2.shape
    assert jnp.allclose(y2, y2_ref, atol=ATOL_F32, rtol=RTOL), "mismatch vs reference (test 2)"

    # ---- Test 3: bf16 x (halved HBM read), batch-fold (g=4) + ragged last tile ----
    kx3, kp3, key = jax.random.split(key, 3)
    B3, C3, L3, r3 = 8, 4, 200, 4
    H3 = C3 * r3
    x3 = jax.random.normal(kx3, (B3, C3, L3), dtype=jnp.bfloat16)
    w1c, b1c, w2c, b2c = _make_params(kp3, C3, H3)
    y3 = jax.block_until_ready(se_block_1d(x3, w1c, b1c, w2c, b2c, tl=128))
    y3_ref = _reference(x3, w1c, b1c, w2c, b2c)
    assert y3.shape == (B3, C3, 1), y3.shape
    assert jnp.allclose(y3.astype(jnp.float32), y3_ref.astype(jnp.float32),
                        atol=ATOL_BF16, rtol=RTOL), "mismatch vs reference (test 3)"

    print("KERNEL_OK")
</pallas_src>

<mosaic_0001>
module attributes {stable_mosaic.version = 11 : i64} {
  func.func @_se_kernel(%arg0: i32, %arg1: i32, %arg2: memref<1x8x16xf32, #tpu.memory_space<vmem>>, %arg3: memref<8x32xf32, #tpu.memory_space<vmem>>, %arg4: memref<1x32xf32, #tpu.memory_space<vmem>>, %arg5: memref<32x8xf32, #tpu.memory_space<vmem>>, %arg6: memref<1x8xf32, #tpu.memory_space<vmem>>, %arg7: memref<1x8xf32, #tpu.memory_space<vmem>>, %arg8: memref<1x8xf32, #tpu.memory_space<vmem>>) attributes {dimension_semantics = [#tpu.dimension_semantics<parallel>, #tpu.dimension_semantics<arbitrary>], iteration_bounds = array<i64: 1, 1>, scalar_prefetch = 0 : i64, scratch_operands = 1 : i64, tpu.core_type = #tpu.core_type<tc>, window_params = [{transform_indices = @transform_0, window_bounds = array<i64: 1, 8, 16>}, {pipeline_mode = #tpu.pipeline_mode<synchronous>, transform_indices = @transform_1, window_bounds = array<i64: 8, 32>}, {pipeline_mode = #tpu.pipeline_mode<synchronous>, transform_indices = @transform_2, window_bounds = array<i64: 1, 32>}, {pipeline_mode = #tpu.pipeline_mode<synchronous>, transform_indices = @transform_3, window_bounds = array<i64: 32, 8>}, {pipeline_mode = #tpu.pipeline_mode<synchronous>, transform_indices = @transform_4, window_bounds = array<i64: 1, 8>}, {transform_indices = @transform_5, window_bounds = array<i64: 1, 8>}]} {
    %c0_i32 = arith.constant 0 : i32
    %0 = arith.cmpi eq, %arg1, %c0_i32 : i32
    %1 = arith.extui %0 : i1 to i32
    %c0_i32_0 = arith.constant 0 : i32
    %2 = arith.cmpi ne, %1, %c0_i32_0 : i32
    scf.if %2 {
      %cst_9 = arith.constant 0.000000e+00 : f32
      %11 = vector.broadcast %cst_9 : f32 to vector<1x8xf32>
      %c0_10 = arith.constant 0 : index
      %c0_11 = arith.constant 0 : index
      %12 = vector.load %arg8[%c0_10, %c0_11] : memref<1x8xf32, #tpu.memory_space<vmem>>, vector<1x8xf32>
      tpu.vector_store %arg8[%c0_10, %c0_11], %11 {strides = array<i32>} : memref<1x8xf32, #tpu.memory_space<vmem>>, vector<1x8xf32>,
    } else {
    }
    %c0 = arith.constant 0 : index
    %c0_1 = arith.constant 0 : index
    %c0_2 = arith.constant 0 : index
    %3 = vector.load %arg2[%c0, %c0_1, %c0_2] : memref<1x8x16xf32, #tpu.memory_space<vmem>>, vector<1x8x16xf32>
    %c0_3 = arith.constant 0 : index
    %c0_4 = arith.constant 0 : index
    %4 = vector.load %arg8[%c0_3, %c0_4] : memref<1x8xf32, #tpu.memory_space<vmem>>, vector<1x8xf32>
    %cst = arith.constant dense<0.000000e+00> : vector<1x8xf32>
    %5 = vector.multi_reduction <add>, %3, %cst [2] : vector<1x8x16xf32> to vector<1x8xf32>
    %6 = arith.addf %4, %5 : vector<1x8xf32>
    %c0_5 = arith.constant 0 : index
    %c0_6 = arith.constant 0 : index
    %7 = vector.load %arg8[%c0_5, %c0_6] : memref<1x8xf32, #tpu.memory_space<vmem>>, vector<1x8xf32>
    tpu.vector_store %arg8[%c0_5, %c0_6], %6 {strides = array<i32>} : memref<1x8xf32, #tpu.memory_space<vmem>>, vector<1x8xf32>,
    %c0_i32_7 = arith.constant 0 : i32
    %8 = arith.cmpi eq, %arg1, %c0_i32_7 : i32
    %9 = arith.extui %8 : i1 to i32
    %c0_i32_8 = arith.constant 0 : i32
    %10 = arith.cmpi ne, %9, %c0_i32_8 : i32
    scf.if %10 {
      %c0_9 = arith.constant 0 : index
      %c0_10 = arith.constant 0 : index
      %11 = vector.load %arg8[%c0_9, %c0_10] : memref<1x8xf32, #tpu.memory_space<vmem>>, vector<1x8xf32>
      %cst_11 = arith.constant 6.250000e-02 : f32
      %12 = vector.broadcast %cst_11 : f32 to vector<1x8xf32>
      %13 = arith.mulf %11, %12 : vector<1x8xf32>
      %c0_12 = arith.constant 0 : index
      %c0_13 = arith.constant 0 : index
      %14 = vector.load %arg3[%c0_12, %c0_13] : memref<8x32xf32, #tpu.memory_space<vmem>>, vector<8x32xf32>
      %cst_14 = arith.constant dense<0.000000e+00> : vector<1x32xf32>
      %15 = tpu.matmul %13, %14, %cst_14 {dimension_numbers = #tpu.dot_dimension_numbers<[1], [0], [0], [1], [0, 0, 1, 1], [], []>} : vector<1x8xf32>, vector<8x32xf32>, vector<1x32xf32> -> vector<1x32xf32>
      %c0_15 = arith.constant 0 : index
      %c0_16 = arith.constant 0 : index
      %16 = vector.load %arg4[%c0_15, %c0_16] : memref<1x32xf32, #tpu.memory_space<vmem>>, vector<1x32xf32>
      %17 = arith.addf %15, %16 : vector<1x32xf32>
      %cst_17 = arith.constant 0.000000e+00 : f32
      %18 = vector.broadcast %cst_17 : f32 to vector<1x32xf32>
      %19 = arith.maximumf %17, %18 : vector<1x32xf32>
      %c0_18 = arith.constant 0 : index
      %c0_19 = arith.constant 0 : index
      %20 = vector.load %arg5[%c0_18, %c0_19] : memref<32x8xf32, #tpu.memory_space<vmem>>, vector<32x8xf32>
      %cst_20 = arith.constant dense<0.000000e+00> : vector<1x8xf32>
      %21 = tpu.matmul %19, %20, %cst_20 {dimension_numbers = #tpu.dot_dimension_numbers<[1], [0], [0], [1], [0, 0, 1, 1], [], []>} : vector<1x32xf32>, vector<32x8xf32>, vector<1x8xf32> -> vector<1x8xf32>
      %c0_21 = arith.constant 0 : index
      %c0_22 = arith.constant 0 : index
      %22 = vector.load %arg6[%c0_21, %c0_22] : memref<1x8xf32, #tpu.memory_space<vmem>>, vector<1x8xf32>
      %23 = arith.addf %21, %22 : vector<1x8xf32>
      %cst_23 = arith.constant 0.000000e+00 : f32
      %24 = vector.broadcast %cst_23 : f32 to vector<1x8xf32>
      %25 = arith.subf %24, %23 : vector<1x8xf32>
      %26 = math.exp %25 : vector<1x8xf32>
      %cst_24 = arith.constant 1.000000e+00 : f32
      %27 = vector.broadcast %cst_24 : f32 to vector<1x8xf32>
      %28 = arith.addf %27, %26 : vector<1x8xf32>
      %29 = tpu.reciprocal %28 {approx = true} : vector<1x8xf32> -> vector<1x8xf32>
      %c0_25 = arith.constant 0 : index
      %c0_26 = arith.constant 0 : index
      %30 = vector.load %arg7[%c0_25, %c0_26] : memref<1x8xf32, #tpu.memory_space<vmem>>, vector<1x8xf32>
      tpu.vector_store %arg7[%c0_25, %c0_26], %29 {strides = array<i32>} : memref<1x8xf32, #tpu.memory_space<vmem>>, vector<1x8xf32>,
    } else {
    }
    return
  }
  func.func @transform_0(%arg0: i32, %arg1: i32) -> (i32, i32, i32) {
    %c0_i32 = arith.constant 0 : i32
    %c0_i32_0 = arith.constant 0 : i32
    return %arg0, %c0_i32, %arg1 : i32, i32, i32
  }
  func.func @transform_1(%arg0: i32, %arg1: i32) -> (i32, i32) {
    %c0_i32 = arith.constant 0 : i32
    %c0_i32_0 = arith.constant 0 : i32
    %c0_i32_1 = arith.constant 0 : i32
    return %c0_i32, %c0_i32_0 : i32, i32
  }
  func.func @transform_2(%arg0: i32, %arg1: i32) -> (i32, i32) {
    %c0_i32 = arith.constant 0 : i32
    %c0_i32_0 = arith.constant 0 : i32
    %c0_i32_1 = arith.constant 0 : i32
    return %c0_i32, %c0_i32_0 : i32, i32
  }
  func.func @transform_3(%arg0: i32, %arg1: i32) -> (i32, i32) {
    %c0_i32 = arith.constant 0 : i32
    %c0_i32_0 = arith.constant 0 : i32
    %c0_i32_1 = arith.constant 0 : i32
    return %c0_i32, %c0_i32_0 : i32, i32
  }
  func.func @transform_4(%arg0: i32, %arg1: i32) -> (i32, i32) {
    %c0_i32 = arith.constant 0 : i32
    %c0_i32_0 = arith.constant 0 : i32
    %c0_i32_1 = arith.constant 0 : i32
    return %c0_i32, %c0_i32_0 : i32, i32
  }
  func.func @transform_5(%arg0: i32, %arg1: i32) -> (i32, i32) {
    %c0_i32 = arith.constant 0 : i32
    %c0_i32_0 = arith.constant 0 : i32
    return %arg0, %c0_i32 : i32, i32
  }
}

</mosaic_0001>

<bundles_post_ra>
// kernel: tpu_custom_call.1
= control target key start
LH: loop header
LB: loop body
LE: loop exit
PB: predicated region body
PF: predicated region fallthrough
CT: control target
= control target key end

     0   :  { %vm29_vm0 = vcmask 130048   ;;  %s464_s0 = inlined_call_operand.vmem [shape: f32[1,8,16], index: 0, kind: input, shape index: {}]   ;;  %s465_s1 = inlined_call_operand.vmem [shape: f32[8,32], index: 1, kind: input, shape index: {}]   ;;  %s466_s2 = inlined_call_operand.vmem [shape: f32[1,32], index: 2, kind: input, shape index: {}]   ;;  %s467_s3 = inlined_call_operand.vmem [shape: f32[32,8], index: 3, kind: input, shape index: {}]   ;;  %s468_s4 = inlined_call_operand.vmem [shape: f32[1,8], index: 4, kind: input, shape index: {}]   ;;  %s469_s5 = inlined_call_operand.hbm [shape: f32[1,8], index: 5, kind: output, shape index: {}]  }
   0x1   :  { %v27_v0 = vld [vmem:[%s464_s0] sm:$0xff] }
   0x2   :  { %10 = vsyncpa [#allocation4], 0  ;;  %v30_v1 = vsel %vm29_vm0, %v27_v0, 0.0  ;;  %v389_v2 = vmov 0   ;;  %v34_v3 = vlaneseq  ;;  %v390_v7 = vmov 1966171168  }
   0x3   :  { %31 = vadd.xlane.f32.xlu0 %v30_v1  ;;  %v71_v8 = vunpack.c.l.s4 %v390_v7  ;;  %vm25_vm1 = vcmask 57344   ;;  %v391_v41 = vmov 0.0   ;;  %v147_v42 = vld [vmem:[%s465_s1] sm:$0xff]  ;;  %vm392_vm2 = vmmov 0   ;;  %v225_v44 = vld [vmem:[%s467_s3 + $0x8] sm:$0xff]  ;;  %v226_v55 = vld [vmem:[%s467_s3 + $0x10] sm:$0xff] }
   0x4   :  { %360 = vset.pattern.permute.xlu0 %v389_v2  ;;  %v35_v4 = vshrl.u32 %v34_v3, 7  ;;  %v119_v5 = vand.u32 127, %v34_v3  ;;  %26 = vst.msk [vmem:[#allocation2] sm:$0x1] %vm25_vm1, %v391_v41  ;;  %332 = vmatprep.subr.mxu0 %v391_v41  ;;  %v224_v43 = vld [vmem:[%s467_s3] sm:$0xff]  ;;  %v393_v45 = vmov 0.0|0.0  }
   0x5   :  { %v72_v9 = vunpack.c.0.s8 %v71_v8  ;;  %333 = vmatpush3.msra.mxu0 %v147_v42  ;;  %334 = vmatprep.mubr.msk.f32.mxu0 %vm392_vm2, %v391_v41  ;;  %v349_v46 = vpack.c.bf16 %v225_v44, %v224_v43  ;;  %vm149_vm3 = vcmask 64512   ;;  %v227_v56 = vld [vmem:[%s467_s3 + $0x18] sm:$0xff]  ;;  %v148_v58 = vld [vmem:[%s466_s2] sm:$0x1]  ;;  %vm229_vm4 = vcmask 261120   ;;  %s394_s2 = smov [#allocation3]  }
   0x6   :  { %v122_v6 = vsub.s32 %v119_v5, %v35_v4  ;;  %v36_v10 = vsub.s32 0, %v35_v4  ;;  %v40_v11 = vsub.s32 1, %v35_v4  ;;  %v44_v12 = vsub.s32 2, %v35_v4  ;;  %345 = vmatprep.mubr.msk.f32.mxu1 %vm392_vm2, %v391_v41  ;;  %348 = vmatprep.subr.bf16.mxu1 %v393_v45  ;;  %v228_v63 = vld [vmem:[%s468_s4] sm:$0x1]  ;;  %s315_s3 = sshll.u32 %s394_s2, 4  ;;  %s316_s3 = int_to_ptr.vmem [resolvable:$true] %s315_s3 }
   0x7   :  { %v48_v13 = vsub.s32 3, %v35_v4  ;;  %v52_v14 = vsub.s32 4, %v35_v4  ;;  %v56_v15 = vsub.s32 5, %v35_v4  ;;  %v60_v16 = vsub.s32 6, %v35_v4  ;;  %350 = vmatpush3.bf16.msra.mxu1 %v349_v46  ;;  %s365_s7 = scalar_lea.vmem %s316_s3, 16  ;;  %s369_s8 = scalar_lea.vmem %s316_s3, 32 }
   0x8   :  { %v64_v17 = vsub.s32 7, %v35_v4  ;;  %v75_v19 = vsub.s32 %v72_v9, %v35_v4  ;;  %351 = vmatprep.subr.bf16.mxu1 %v393_v45  ;;  %v352_v57 = vpack.c.bf16 %v227_v56, %v226_v55  ;;  %p366_p0 = scmp.ne.s32.totalorder %s316_s3, %s365_s7  ;;  %p370_p1 = scmp.lt.s32.totalorder %s316_s3, %s316_s3 }
   0x9   :  { %p371_p2 = scmp.lt.s32.totalorder %s369_s8, %s365_s7 }
   0xb   :  { %v28_v50 = vld [vmem:[#allocation2] sm:$0x1]  ;;  %353 = vmatpush3.bf16.msra.mxu1 %v352_v57  ;;  %p372_p3 = por %p371_p2, %p370_p1 }
   0xd   :  { %p373_p4 = pnand %p372_p3, %p366_p0 }
  0x90   :  { %v32_v18 = vpop.xlane.xlu0 %31 }
  0x91   :  { %v37_v20 = vrot.slane %v32_v18, %v36_v10  ;;  %v41_v21 = vrot.slane %v32_v18, %v40_v11  ;;  %v45_v22 = vrot.slane %v32_v18, %v44_v12  ;;  %v49_v23 = vrot.slane %v32_v18, %v48_v13 }
  0x92   :  { %v53_v24 = vrot.slane %v32_v18, %v52_v14  ;;  %v57_v25 = vrot.slane %v32_v18, %v56_v15  ;;  %v61_v26 = vrot.slane %v32_v18, %v60_v16  ;;  %v65_v27 = vrot.slane %v32_v18, %v64_v17 }
  0x93   :  { %v66_v28 = vcombine.low %v37_v20, %v41_v21  ;;  %v67_v29 = vcombine.low %v45_v22, %v49_v23 }
  0x94   :  { %v68_v30 = vcombine.low %v53_v24, %v57_v25  ;;  %v69_v31 = vcombine.low %v61_v26, %v65_v27 }
  0x95   :  { %v76_v32 = vrot.slane %v66_v28, %v75_v19  ;;  %v83_v33 = vrot.slane %v67_v29, %v75_v19 }
  0x96   :  { %v90_v34 = vrot.slane %v68_v30, %v75_v19  ;;  %v97_v35 = vrot.slane %v69_v31, %v75_v19 }
  0x97   :  { %v98_v36 = vcombine.low %v76_v32, %v83_v33 }
  0x98   :  { %v99_v37 = vcombine.low %v90_v34, %v97_v35 }
  0x99   :  { %v106_v38 = vrot.slane %v98_v36, %v75_v19 }
  0x9a   :  { %v113_v39 = vrot.slane %v99_v37, %v75_v19 }
  0x9c   :  { %v114_v40 = vcombine.low %v106_v38, %v113_v39 }
  0x9e   :  { %116 = vperm.xlu0 %360, %v114_v40  }
 0x11d   :  { %v117_v47 = vpop.permute.xlu0 %116 }
 0x11e   :  { %v123_v48 = vrot.slane %v117_v47, %v122_v6 }
 0x120   :  { %v130_v49 = vrot.slane %v123_v48, %v75_v19 }
 0x122   :  { %v137_v51 = vrot.slane %v130_v49, %v75_v19 }
 0x124   :  { %v139_v52 = vadd.f32 %v137_v51, %v28_v50 }
 0x126   :  { %141 = vst.msk [vmem:[#allocation2] sm:$0x1] %vm25_vm1, %v139_v52 }
 0x12d   :  { %v145_v53 = vld [vmem:[#allocation2] sm:$0x1] }
 0x12e   :  { %v146_v54 = vmul.f32 0.0625, %v145_v53 }
 0x130   :  { %335 = vmatmul.mubr.msk.f32.vlgmr.msra.gmra.mrb[0].mxu0 %vm149_vm3, %v146_v54 }
 0x203   :  { %v219_v59 = vpop.f32.mrb[0].mxu0 }
 0x204   :  { %v220_v60 = vadd.f32 %v219_v59, %v148_v58  ;;  %v336_v61 = vpop.f32.mrb[1].mxu0 }
 0x206   :  { %v223_v62 = vmax.f32 %v220_v60, 0.0 }
 0x208   :  { %346 = vmatmul.mubr.msk.f32.vlgmr.msra.gmra.mrb[0].mxu1 %vm229_vm4, %v223_v62 }
 0x2db   :  { %v299_v0 = vpop.f32.mrb[0].mxu1 }
 0x2dc   :  { %v300_v1 = vadd.f32 %v299_v0, %v228_v63  ;;  %v347_v2 = vpop.f32.mrb[1].mxu1 }
 0x2de   :  { %v303_v3 = vsub.f32 0.0, %v300_v1 }
 0x2e0   :  { %v304_v4 = vmul.f32 1.442695, %v303_v3 }
 0x2e2   :  { %361 = vpow2.f32 %v304_v4 }
 0x2ec   :  { %v362_v5 = vpop.eup %361 }
 0x2ed   :  { %v306_v6 = vadd.f32 1.0, %v362_v5 }
 0x2ef   :  { %363 = vrcp.f32 %v306_v6 }
 0x2f9   :  { %v364_v7 = vpop.eup %363 }
 0x2fa   :  { %308 = vst.msk [vmem:[#allocation3] sm:$0x1] %vm25_vm1, %v364_v7 }
 0x2fb   :  { %376 = shalt.err (!%p373_p4)
}
 0x2fc   :  { %s377_s10 = scalar_lea.hbm %s469_s5, 16 }
 0x2fd   :  { %p378_p5 = scmp.ne.s32.totalorder %s469_s5, %s377_s10  ;;  %p381_p6 = scmp.lt.u32.totalorder %s377_s10, %s469_s5 }
 0x2ff   :  { %p383_p7 = pnand %p381_p6, %p378_p5 }
 0x301   :  { %386 = shalt.err (!%p383_p7)
}
 0x302   :  { %318 = dma.vmem_to_hbm [thread:$0]  %s316_s3, 16, %s469_s5, [#allocation4]  }
 0x303   :  { %387 = dma.done.wait [#allocation4], 16  }
 0x304   :  { %388 = vsyncadd [#allocation4], 4294967280 }
 0x305   :  { %322 = vsyncpa [#allocation4], 1 }

</bundles_post_ra>
